<compile_context>
chip_gen: v5e
topology: v5e:2x2
jax: 0.10.0
libtpu: 0.0.40
codegen_flags: <defaults>
</compile_context>

<pallas_src>
import functools
import math

import jax
import jax.numpy as jnp
from jax.experimental import pallas as pl
from jax.experimental.pallas import tpu as pltpu


def _tile(dim, pref):
    """Largest clean tile: preferred size if it divides dim, else the full dim."""
    return pref if dim % pref == 0 else dim


def _pick_head_block(num_heads, lq, lkv, head_dim):
    """Heads per attention grid step, bounded by a VMEM budget for the f32 score buffers."""
    per_head = lq * lkv * 4 * 3 + lq * 3 * head_dim  # scores + exp + probs (+ qkv slab)
    hb = max(1, min(num_heads, (8 * 1024 * 1024) // max(per_head, 1)))
    while num_heads % hb:
        hb -= 1
    return hb


# ---------------- Kernel 1: W8A8B8O8 fused-QKV linear (int8 in, int8 out, head-major) ---------
def _qkv_kernel(x_ref, w_ref, b_ref, o_ref, acc_ref, *, a_scale, b_scale):
    kt = pl.program_id(3)

    @pl.when(kt == 0)
    def _():
        acc_ref[...] = jnp.zeros_like(acc_ref)

    x = x_ref[0].astype(jnp.bfloat16)                       # (tl, tk)  exact for int8
    w = w_ref[0].astype(jnp.bfloat16)                       # (tk, 3D)
    acc_ref[...] += jnp.dot(x, w, preferred_element_type=jnp.float32)

    @pl.when(kt == pl.num_programs(3) - 1)
    def _():
        y = acc_ref[...] * a_scale + b_ref[0].astype(jnp.float32) * b_scale
        y = jnp.clip(jnp.round(y), -128.0, 127.0)
        o_ref[0, 0] = y.astype(jnp.int8)


def qkv_linear_int8(x, w_r, b_r, a_scale, b_scale, *, tl_pref=256, tk_pref=512):
    """x: (B, L, K) int8; w_r: (H, K, 3D) int8; b_r: (H, 1, 3D) int8 -> (B, H, L, 3D) int8."""
    B, L, K = x.shape
    H, _, N3 = w_r.shape
    tl = _tile(L, tl_pref)
    tk = _tile(K, tk_pref)
    grid = (B, H, L // tl, K // tk)
    kernel = functools.partial(_qkv_kernel, a_scale=float(a_scale), b_scale=float(b_scale))
    return pl.pallas_call(
        kernel,
        out_shape=jax.ShapeDtypeStruct((B, H, L, N3), jnp.int8),
        grid=grid,
        in_specs=[
            pl.BlockSpec((1, tl, tk), lambda b, h, l, k: (b, l, k)),
            pl.BlockSpec((1, tk, N3), lambda b, h, l, k: (h, k, 0)),
            pl.BlockSpec((1, 1, N3), lambda b, h, l, k: (h, 0, 0)),
        ],
        out_specs=pl.BlockSpec((1, 1, tl, N3), lambda b, h, l, k: (b, h, l, 0)),
        scratch_shapes=[pltpu.VMEM((tl, N3), jnp.float32)],
        compiler_params=pltpu.CompilerParams(
            dimension_semantics=("parallel", "parallel", "parallel", "arbitrary")),
    )(x, w_r, b_r)


# ---------------- Kernel 2: batched-head attention core (int8 ctx epilogue) ----------------
def _attention_kernel(qkv_ref, alibi_ref, bias_ref, o_ref, *, head_dim, inv_norm, beta):
    D = head_dim
    qkv = qkv_ref[0]                                        # (Hb, L, 3D) int8
    q = qkv[:, :, 0:D].astype(jnp.bfloat16)
    k = qkv[:, :, D:2 * D].astype(jnp.bfloat16)
    v = qkv[:, :, 2 * D:3 * D].astype(jnp.float32)          # torch.bmm(probs_f32, value)

    # qk_bmm (BMM_S8T_S8N_F32T, alpha=1.0): Q @ K^T, f32 accumulation on the MXU.
    s = jnp.einsum("hqd,hkd->hqk", q, k, preferred_element_type=jnp.float32)
    # alibi*beta + s*inv_norm, with the mask folded in as an additive bias (finfo.min or 0).
    scores = s * inv_norm + alibi_ref[0] * beta + bias_ref[0]

    m = jnp.max(scores, axis=-1, keepdims=True)
    e = jnp.exp(scores - m)
    p = e * pl.reciprocal(jnp.sum(e, axis=-1, keepdims=True), approx=True)

    ctx = jnp.einsum("hqk,hkd->hqd", p, v, preferred_element_type=jnp.float32)
    # Fused re-quantization to the int8 domain expected by the W8A8 dense
    # (output scale 1.0 here, matching the reference harness).
    o_ref[0] = jnp.clip(jnp.round(ctx), -128.0, 127.0).astype(jnp.int8)


def attention_core(fused, alibi, mask_bias, head_dim, inv_norm, beta):
    """fused: (B,H,L,3D) int8; alibi: (B,H,1,Lkv) f32; mask_bias: (B,1,Lq,Lkv) f32
       -> (B,H,Lq,D) int8 quantized context."""
    B, H, L, _ = fused.shape
    Lkv = alibi.shape[-1]
    hb = _pick_head_block(H, L, Lkv, head_dim)
    kernel = functools.partial(_attention_kernel, head_dim=head_dim,
                               inv_norm=float(inv_norm), beta=float(beta))
    return pl.pallas_call(
        kernel,
        out_shape=jax.ShapeDtypeStruct((B, H, L, head_dim), jnp.int8),
        grid=(B, H // hb),
        in_specs=[
            pl.BlockSpec((1, hb, L, 3 * head_dim), lambda b, g: (b, g, 0, 0)),
            pl.BlockSpec((1, hb, 1, Lkv), lambda b, g: (b, g, 0, 0)),
            pl.BlockSpec((1, 1, L, Lkv), lambda b, g: (b, 0, 0, 0)),
        ],
        out_specs=pl.BlockSpec((1, hb, L, head_dim), lambda b, g: (b, g, 0, 0)),
        compiler_params=pltpu.CompilerParams(
            dimension_semantics=("parallel", "parallel")),
    )(fused, alibi, mask_bias)


# ---------------- Kernel 3: W8A8BFP32OFP32 dense + residual (heads on the K axis) ----------
def _dense_kernel(ctx_ref, w_ref, b_ref, r_ref, o_ref, acc_ref, *, a_scale):
    h = pl.program_id(3)

    @pl.when(h == 0)
    def _():
        acc_ref[...] = jnp.zeros_like(acc_ref)

    x = ctx_ref[0, 0].astype(jnp.bfloat16)                  # (tl, D) int8-valued
    w = w_ref[0].astype(jnp.bfloat16)                       # (D, tn)
    acc_ref[...] += jnp.dot(x, w, preferred_element_type=jnp.float32)

    @pl.when(h == pl.num_programs(3) - 1)
    def _():
        o_ref[0] = acc_ref[...] * a_scale + b_ref[...] + r_ref[0]


def dense_residual(ctx, w_r, b, residual, a_scale, *, tl_pref=256, tn_pref=512):
    """ctx: (B,H,L,D) int8; w_r: (H,D,N) int8; b: (1,N) f32; residual: (B,L,N) f32 -> (B,L,N) f32.
    The merge-heads transpose is folded away by putting heads on the reduction grid axis."""
    B, H, L, D = ctx.shape
    N = w_r.shape[-1]
    tl = _tile(L, tl_pref)
    tn = _tile(N, tn_pref)
    grid = (B, L // tl, N // tn, H)
    kernel = functools.partial(_dense_kernel, a_scale=float(a_scale))
    return pl.pallas_call(
        kernel,
        out_shape=jax.ShapeDtypeStruct((B, L, N), jnp.float32),
        grid=grid,
        in_specs=[
            pl.BlockSpec((1, 1, tl, D), lambda b, l, n, h: (b, h, l, 0)),
            pl.BlockSpec((1, D, tn), lambda b, l, n, h: (h, 0, n)),
            pl.BlockSpec((1, tn), lambda b, l, n, h: (0, n)),
            pl.BlockSpec((1, tl, tn), lambda b, l, n, h: (b, l, n)),
        ],
        out_specs=pl.BlockSpec((1, tl, tn), lambda b, l, n, h: (b, l, n)),
        scratch_shapes=[pltpu.VMEM((tl, tn), jnp.float32)],
        compiler_params=pltpu.CompilerParams(
            dimension_semantics=("parallel", "parallel", "parallel", "arbitrary")),
    )(ctx, w_r, b, residual)


# ---------------- Parameters (weights pre-packed once into kernel-native layouts) ----------
def init_params(key, hidden_size, num_heads):
    head_dim = hidden_size // num_heads
    assert head_dim * num_heads == hidden_size
    H, D = num_heads, head_dim
    k1, k2, k3, k4 = jax.random.split(key, 4)

    # Reference layouts: qkv_w (3*HID, HID) int8 with N ordered (H, 3, D); dense_w (HID, HID).
    qkv_w = jax.random.randint(k1, (3 * hidden_size, hidden_size), -127, 128, jnp.int32).astype(jnp.int8)
    qkv_b = jax.random.randint(k2, (1, 3 * hidden_size), -127, 128, jnp.int32).astype(jnp.int8)
    dense_w = jax.random.randint(k3, (hidden_size, hidden_size), -127, 128, jnp.int32).astype(jnp.int8)
    dense_b = jax.random.normal(k4, (1, hidden_size), jnp.float32)

    params = {
        "hidden_size": hidden_size,
        "num_heads": H,
        "head_dim": D,
        "inv_norm_factor": 1.0 / math.sqrt(D),
        "beta": 1.0,
        # one-time pre-transposed / head-grouped layouts (avoid per-tile transposes in-kernel):
        #   qkv_w_r[h, k, s*D+d]  = qkv_w[h*3*D + s*D + d, k]     -> (H, K, 3D)
        #   qkv_b_r[h, 0, s*D+d]  = qkv_b[0, h*3*D + s*D + d]     -> (H, 1, 3D)
        #   dense_w_r[h, d, n]    = dense_w[n, h*D + d]           -> (H, D, N)
        "qkv_w_r": jnp.transpose(qkv_w.reshape(H, 3 * D, hidden_size), (0, 2, 1)),
        "qkv_b_r": qkv_b.reshape(H, 1, 3 * D),
        "qkv_a": 0.002,
        "qkv_bscale": 1.0,
        "dense_w_r": jnp.transpose(dense_w, (1, 0)).reshape(H, D, hidden_size),
        "dense_b": dense_b,
        "dense_a": 0.0005,
    }
    return params


def int8_bloom_attention_forward(params, hidden_states, residual, alibi, attention_mask):
    B, L, HID = hidden_states.shape
    H = params["num_heads"]
    D = params["head_dim"]

    # Fused int8 QKV projection, written directly head-major: (B, H, L, 3*D).
    fused = qkv_linear_int8(hidden_states, params["qkv_w_r"], params["qkv_b_r"],
                            params["qkv_a"], params["qkv_bscale"])

    # Additive mask bias (== masked_fill with finfo.min after the add, since scores << 1e38).
    alibi_r = alibi.reshape(B, H, 1, alibi.shape[-1])
    neg = jnp.finfo(jnp.float32).min
    mask_bias = jnp.where(attention_mask, neg, 0.0).astype(jnp.float32)

    # Per-(batch, head-group) attention; int8 context out.
    ctx = attention_core(fused, alibi_r, mask_bias, D,
                         params["inv_norm_factor"], params["beta"])

    # W8A8BFP32OFP32 dense + bias + residual, reading the head-major context directly.
    out = dense_residual(ctx, params["dense_w_r"], params["dense_b"],
                         residual, params["dense_a"])
    return out


if __name__ == "__main__":
    B, L, HID, H = 2, 8, 32, 4

    key = jax.random.PRNGKey(0)
    kp, kx, kr, ka = jax.random.split(key, 4)
    params = init_params(kp, HID, H)

    hidden_states = jax.random.randint(kx, (B, L, HID), -127, 128, jnp.int32).astype(jnp.int8)
    residual = jax.random.normal(kr, (B, L, HID), jnp.float32)
    alibi = 0.1 * jax.random.normal(ka, (B * H, 1, L), jnp.float32)
    # causal mask: True above the diagonal => masked
    causal = jnp.triu(jnp.ones((L, L), dtype=jnp.bool_), k=1)
    attention_mask = jnp.broadcast_to(causal[None, None, :, :], (B, 1, L, L))

    out = int8_bloom_attention_forward(params, hidden_states, residual, alibi, attention_mask)
    out = jax.block_until_ready(out)

    assert out.shape == (B, L, HID) and out.dtype == jnp.float32
    assert bool(jnp.all(jnp.isfinite(out)))
    print("KERNEL_OK")
</pallas_src>

<mosaic_0001>
module attributes {stable_mosaic.version = 11 : i64} {
  func.func @_qkv_kernel(%arg0: i32, %arg1: i32, %arg2: i32, %arg3: i32, %arg4: memref<1x8x32xi8, #tpu.memory_space<vmem>>, %arg5: memref<1x32x24xi8, #tpu.memory_space<vmem>>, %arg6: memref<1x1x24xi8, #tpu.memory_space<vmem>>, %arg7: memref<1x1x8x24xi8, #tpu.memory_space<vmem>>, %arg8: memref<8x24xf32, #tpu.memory_space<vmem>>) attributes {dimension_semantics = [#tpu.dimension_semantics<parallel>, #tpu.dimension_semantics<parallel>, #tpu.dimension_semantics<parallel>, #tpu.dimension_semantics<arbitrary>], iteration_bounds = array<i64: 2, 4, 1, 1>, scalar_prefetch = 0 : i64, scratch_operands = 1 : i64, tpu.core_type = #tpu.core_type<tc>, window_params = [{transform_indices = @transform_0, window_bounds = array<i64: 1, 8, 32>}, {transform_indices = @transform_1, window_bounds = array<i64: 1, 32, 24>}, {transform_indices = @transform_2, window_bounds = array<i64: 1, 1, 24>}, {transform_indices = @transform_3, window_bounds = array<i64: 1, 1, 8, 24>}]} {
    %c0_i32 = arith.constant 0 : i32
    %0 = arith.cmpi eq, %arg3, %c0_i32 : i32
    %1 = arith.extui %0 : i1 to i32
    %c0_i32_0 = arith.constant 0 : i32
    %2 = arith.cmpi ne, %1, %c0_i32_0 : i32
    scf.if %2 {
      %cst_12 = arith.constant 0.000000e+00 : f32
      %16 = vector.broadcast %cst_12 : f32 to vector<8x24xf32>
      %c0_13 = arith.constant 0 : index
      %c0_14 = arith.constant 0 : index
      %17 = vector.load %arg8[%c0_13, %c0_14] : memref<8x24xf32, #tpu.memory_space<vmem>>, vector<8x24xf32>
      tpu.vector_store %arg8[%c0_13, %c0_14], %16 {strides = array<i32>} : memref<8x24xf32, #tpu.memory_space<vmem>>, vector<8x24xf32>,
    } else {
    }
    %c0 = arith.constant 0 : index
    %c0_1 = arith.constant 0 : index
    %c0_2 = arith.constant 0 : index
    %3 = vector.load %arg4[%c0, %c0_1, %c0_2] : memref<1x8x32xi8, #tpu.memory_space<vmem>>, vector<1x8x32xi8>
    %4 = vector.shape_cast %3 : vector<1x8x32xi8> to vector<8x32xi8>
    %5 = arith.sitofp %4 : vector<8x32xi8> to vector<8x32xbf16>
    %c0_3 = arith.constant 0 : index
    %c0_4 = arith.constant 0 : index
    %c0_5 = arith.constant 0 : index
    %6 = vector.load %arg5[%c0_3, %c0_4, %c0_5] : memref<1x32x24xi8, #tpu.memory_space<vmem>>, vector<1x32x24xi8>
    %7 = vector.shape_cast %6 : vector<1x32x24xi8> to vector<32x24xi8>
    %8 = arith.sitofp %7 : vector<32x24xi8> to vector<32x24xbf16>
    %c0_6 = arith.constant 0 : index
    %c0_7 = arith.constant 0 : index
    %9 = vector.load %arg8[%c0_6, %c0_7] : memref<8x24xf32, #tpu.memory_space<vmem>>, vector<8x24xf32>
    %cst = arith.constant dense<0.000000e+00> : vector<8x24xf32>
    %10 = tpu.matmul %5, %8, %cst {dimension_numbers = #tpu.dot_dimension_numbers<[1], [0], [0], [1], [0, 0, 1, 1], [], []>} : vector<8x32xbf16>, vector<32x24xbf16>, vector<8x24xf32> -> vector<8x24xf32>
    %11 = arith.addf %9, %10 : vector<8x24xf32>
    %c0_8 = arith.constant 0 : index
    %c0_9 = arith.constant 0 : index
    %12 = vector.load %arg8[%c0_8, %c0_9] : memref<8x24xf32, #tpu.memory_space<vmem>>, vector<8x24xf32>
    tpu.vector_store %arg8[%c0_8, %c0_9], %11 {strides = array<i32>} : memref<8x24xf32, #tpu.memory_space<vmem>>, vector<8x24xf32>,
    %c0_i32_10 = arith.constant 0 : i32
    %13 = arith.cmpi eq, %arg3, %c0_i32_10 : i32
    %14 = arith.extui %13 : i1 to i32
    %c0_i32_11 = arith.constant 0 : i32
    %15 = arith.cmpi ne, %14, %c0_i32_11 : i32
    scf.if %15 {
      %c0_12 = arith.constant 0 : index
      %c0_13 = arith.constant 0 : index
      %16 = vector.load %arg8[%c0_12, %c0_13] : memref<8x24xf32, #tpu.memory_space<vmem>>, vector<8x24xf32>
      %cst_14 = arith.constant 2.000000e-03 : f32
      %17 = vector.broadcast %cst_14 : f32 to vector<8x24xf32>
      %18 = arith.mulf %16, %17 : vector<8x24xf32>
      %c0_15 = arith.constant 0 : index
      %c0_16 = arith.constant 0 : index
      %c0_17 = arith.constant 0 : index
      %19 = vector.load %arg6[%c0_15, %c0_16, %c0_17] : memref<1x1x24xi8, #tpu.memory_space<vmem>>, vector<1x1x24xi8>
      %20 = vector.shape_cast %19 : vector<1x1x24xi8> to vector<1x24xi8>
      %21 = arith.sitofp %20 : vector<1x24xi8> to vector<1x24xf32>
      %cst_18 = arith.constant 1.000000e+00 : f32
      %22 = vector.broadcast %cst_18 : f32 to vector<1x24xf32>
      %23 = arith.mulf %21, %22 : vector<1x24xf32>
      %24 = vector.broadcast %23 : vector<1x24xf32> to vector<8x24xf32>
      %25 = arith.addf %18, %24 : vector<8x24xf32>
      %26 = math.roundeven %25 : vector<8x24xf32>
      %cst_19 = arith.constant -1.280000e+02 : f32
      %cst_20 = arith.constant 1.270000e+02 : f32
      %27 = vector.broadcast %cst_19 : f32 to vector<8x24xf32>
      %28 = arith.maximumf %27, %26 : vector<8x24xf32>
      %29 = vector.broadcast %cst_20 : f32 to vector<8x24xf32>
      %30 = arith.minimumf %29, %28 : vector<8x24xf32>
      %31 = arith.fptosi %30 : vector<8x24xf32> to vector<8x24xi8>
      %c0_21 = arith.constant 0 : index
      %c0_22 = arith.constant 0 : index
      %c0_23 = arith.constant 0 : index
      %c0_24 = arith.constant 0 : index
      %32 = vector.load %arg7[%c0_21, %c0_22, %c0_23, %c0_24] : memref<1x1x8x24xi8, #tpu.memory_space<vmem>>, vector<1x1x8x24xi8>
      %33 = vector.shape_cast %32 : vector<1x1x8x24xi8> to vector<8x24xi8>
      %34 = vector.shape_cast %31 : vector<8x24xi8> to vector<1x1x8x24xi8>
      tpu.vector_store %arg7[%c0_21, %c0_22, %c0_23, %c0_24], %34 {strides = array<i32>} : memref<1x1x8x24xi8, #tpu.memory_space<vmem>>, vector<1x1x8x24xi8>,
    } else {
    }
    return
  }
  func.func @transform_0(%arg0: i32, %arg1: i32, %arg2: i32, %arg3: i32) -> (i32, i32, i32) {
    %c0_i32 = arith.constant 0 : i32
    return %arg0, %arg2, %arg3 : i32, i32, i32
  }
  func.func @transform_1(%arg0: i32, %arg1: i32, %arg2: i32, %arg3: i32) -> (i32, i32, i32) {
    %c0_i32 = arith.constant 0 : i32
    %c0_i32_0 = arith.constant 0 : i32
    return %arg1, %arg3, %c0_i32 : i32, i32, i32
  }
  func.func @transform_2(%arg0: i32, %arg1: i32, %arg2: i32, %arg3: i32) -> (i32, i32, i32) {
    %c0_i32 = arith.constant 0 : i32
    %c0_i32_0 = arith.constant 0 : i32
    %c0_i32_1 = arith.constant 0 : i32
    return %arg1, %c0_i32, %c0_i32_0 : i32, i32, i32
  }
  func.func @transform_3(%arg0: i32, %arg1: i32, %arg2: i32, %arg3: i32) -> (i32, i32, i32, i32) {
    %c0_i32 = arith.constant 0 : i32
    %c0_i32_0 = arith.constant 0 : i32
    return %arg0, %arg1, %arg2, %c0_i32 : i32, i32, i32, i32
  }
}

</mosaic_0001>

<bundles_post_ra>
// kernel: tpu_custom_call.1
= control target key start
LH: loop header
LB: loop body
LE: loop exit
PB: predicated region body
PF: predicated region fallthrough
CT: control target
= control target key end

     0   :  { %8 = vsyncpa [#allocation4], 0  ;;  %s792_s0 = inlined_call_operand.vmem [shape: s8[2,8,32], index: 0, kind: input, shape index: {}]   ;;  %s793_s1 = inlined_call_operand.vmem [shape: s8[4,32,24], index: 1, kind: input, shape index: {}]   ;;  %s794_s2 = inlined_call_operand.vmem [shape: s8[4,1,24], index: 2, kind: input, shape index: {}]   ;;  %s795_s3 = inlined_call_operand.hbm [shape: s8[2,4,8,24], index: 3, kind: output, shape index: {}]  }
   0x1   :  { %10 = vsyncpa [#allocation4 + $0x1], 0  ;;  %s662_s12 = smov 0   ;;  %s664_s13 = smov 0  }
   0x2   :  { %s666_s14 = smov 0   ;;  %s668_s15 = smov 0  }
   0x3   :  { %s670_s16 = smov 0   ;;  %s672_s17 = smov 0  }
   0x4   :  { %s674_s18 = smov 0   ;;  %s676_s19 = smov 0  }
   0x5 LB: > { %s451_s20 = sadd.s32 4294967295, %s639_s19   ;;  %s452_s21 = sadd.s32 4294967294, %s639_s19   ;;  %s639_s19 = sphi %s676_s19, %s16_s19   ;;  %s635_s18 = sphi %s674_s18, %s804_s18   ;;  %s631_s17 = sphi %s672_s17, %s803_s17   ;;  %s627_s16 = sphi %s670_s16, %s802_s16   ;;  %s623_s15 = sphi %s668_s15, %s801_s15   ;;  %s619_s14 = sphi %s666_s14, %s800_s14   ;;  %s615_s13 = sphi %s664_s13, %s799_s13   ;;  %s611_s12 = sphi %s662_s12, %s798_s12  }
   0x6   : > { %s38_s22 = sadd.s32 1, %s631_s17  ;;  %s42_s23 = sadd.s32 1, %s635_s18 }
   0x7   : > { %p40_p0 = scmp.ge.s32.totalorder %s38_s22, 4  ;;  %p147_p1 = scmp.ne.s32.totalorder %s619_s14, %s615_s13 }
   0x8   : > { %p148_p2 = scmp.eq.s32.totalorder %s451_s20, 7  ;;  %p153_p5 = scmp.ne.s32.totalorder %s615_s13, %s611_s12 }
   0x9   : > { %s806_s22 = smov (%p40_p0, %s38_s22), 0  ;;  %s808_s23 = smov (!%p40_p0, %s42_s23), %s635_s18 }
   0xa   : > { %s131_s24 = ssub.s32 %s631_s17, %s806_s22  ;;  %p713_p3 = por %p148_p2, %p147_p1 }
   0xb   : > { %p44_p4 = scmp.ge.s32.totalorder %s808_s23, 2  ;;  %p154_p6 = scmp.eq.s32.totalorder %s452_s21, 7 }
   0xc   : > { %p455_p7 = scmp.ge.s32.totalorder %s639_s19, 1  ;;  %p201_p9 = scmp.lt.s32.totalorder %s639_s19, 9 }
   0xd   : > { %s810_s23 = smov (%p44_p4, %s808_s23), 0  ;;  %p722_p8 = por %p154_p6, %p153_p5 }
   0xe   : > { %s130_s27 = ssub.s32 %s635_s18, %s810_s23  ;;  %s137_s28 = sadd.s32 1, %s619_s14 }
   0xf   : > { %s132_s29 = sor.u32 %s131_s24, %s130_s27  ;;  %p202_p10 = pnand %p455_p7, %p201_p9 }
  0x10   : > { %p135_p11 = scmp.eq.s32.totalorder %s132_s29, 0  ;;  %p250_p12 = scmp.lt.s32.totalorder (!%p202_p10), %s623_s15, 3 }
  0x11   : > { %205 = sbr.rel (%p202_p10) target bundleno = 193 (0xc1), region = 32  ;;  %p240_p13 = scmp.lt.s32.totalorder (!%p202_p10), %s627_s16, 1 }
  0x12   : > { %s731_s30 = scalar_select %p135_p11, %s619_s14, %s137_s28  }
  0x13   : > { %s466_s29 = sshll.u32 (!%p202_p10), %s627_s16, 2 }
  0x16   : > { %vm265_vm0 = vcmask 195584   ;;  %v641_v0 = vmov 0.0   ;;  %s251_s4 = scalar_select %p250_p12, %s623_s15, 3  ;;  %vm283_vm1 = vcmask 261120   ;;  %vm321_vm2 = vcmask 189440  }
  0x17   : > { %266 = vst.msk [vmem:[#allocation2] sm:$0xff] %vm265_vm0, %v641_v0  ;;  %s241_s5 = scalar_select %p240_p13, %s627_s16, 1 }
  0x18   : > { %s458_s6 = sshll.u32 %s251_s4, 3  ;;  %s259_s28 = scalar_lea.vmem %s794_s2, %s251_s4 }
  0x19   : > { %s256_s9 = scalar_lea.vmem %s793_s1, %s458_s6  ;;  %s457_s10 = sshll.u32 %s241_s5, 1  ;;  %v308_v16 = vld [vmem:[%s259_s28] sm:$0x1] }
  0x1a   : > { %v271_v1 = vld [vmem:[%s256_s9] sm:$0xff]  ;;  %s249_s21 = scalar_lea.vmem %s792_s0, %s457_s10  ;;  %v309_v19 = vunpack.c.0.s8 %v308_v16  ;;  %s237_s5 = sand.u32 1, %s615_s13  }
  0x1b   : > { %v274_v2 = vunpack.c.2.s8 %v271_v1  ;;  %v275_v3 = vunpack.c.3.s8 %v271_v1  ;;  %v272_v4 = vunpack.c.0.s8 %v271_v1  ;;  %v273_v5 = vunpack.c.1.s8 %v271_v1  ;;  %v267_v6 = vld [vmem:[%s249_s21] sm:$0x3]  ;;  %s335_s6 = sadd.s32 %s623_s15, %s466_s29  ;;  %s456_s7 = sshll.u32 %s237_s5, 1 }
  0x1c   : > { %v268_v7 = vunpack.c.0.s8 %v267_v6  ;;  %v310_v21 = vcvt.s32.f32 %v309_v19  ;;  %s467_s8 = sshll.u32 %s335_s6, 1  ;;  %s239_s11 = scalar_lea.vmem [#allocation3], %s456_s7 }
  0x1d   : > { %v278_v8 = vcvt.s32.f32 %v274_v2  ;;  %v279_v9 = vcvt.s32.f32 %v275_v3  ;;  %v276_v10 = vcvt.s32.f32 %v272_v4  ;;  %v277_v11 = vcvt.s32.f32 %v273_v5  ;;  %s337_s10 = scalar_lea.hbm %s795_s3, %s467_s8  ;;  %s339_s20 = sshll.u32 %s239_s11, 4  ;;  %s340_s20 = int_to_ptr.vmem [resolvable:$true] %s339_s20 }
  0x1e   : > { %v269_v13 = vcvt.s32.f32 %v268_v7  ;;  %v282_v17 = vld [vmem:[#allocation2] sm:$0xff]  ;;  %v311_v23 = vperm.slane %v310_v21, 0  ;;  %s341_s21 = sshll.u32 %s337_s10, 4  ;;  %s324_s15 = scalar_lea.sflag [#allocation4], %s237_s5  ;;  %s342_s21 = int_to_ptr.hbm [resolvable:$true] %s341_s21 }
  0x1f   : > { %v281_v12 = vpack.c.bf16 %v279_v9, %v278_v8  ;;  %v280_v14 = vpack.c.bf16 %v277_v11, %v276_v10  ;;  %s559_s16 = sshra.s32 %s342_s21, 4  ;;  %s565_s29 = scalar_lea.hbm %s795_s3, 16  ;;  %s560_s16 = int_to_ptr.hbm [resolvable:$true] %s559_s16 }
  0x20   : > { %v270_v15 = vpack.c.bf16 %v269_v13, %v269_v13  ;;  %s561_s24 = scalar_lea.hbm %s560_s16, 2  ;;  %p566_p4 = scmp.lt.s32.totalorder %s560_s16, %s795_s3 }
  0x21   : > { %293 = vmatpush.bf16.msra.mxu0 %v281_v12  ;;  %p562_p0 = scmp.ne.s32.totalorder %s560_s16, %s561_s24  ;;  %p567_p5 = scmp.lt.s32.totalorder %s565_s29, %s561_s24 }
  0x23   : > { %p563_p1 = pnand %p562_p0, %p713_p3  ;;  %p568_p6 = por %p567_p5, %p566_p4 }
  0x25   : > { %294 = vmatpush.bf16.msra.mxu0 %v280_v14  ;;  %p564_p2 = pneg %p563_p1 }
  0x27   : > { %p569_p7 = pnand %p568_p6, %p564_p2 }
  0x28   : > { %459 = vmatmul.msk.bf16.vlgmr.msra.gmra.mxu0 %vm283_vm1, %v270_v15 }
  0xa5   : > { %v296_v18 = vpop.f32.mrf.mxu0 }
  0xa6   : > { %v300_v20 = vadd.f32 %v296_v18, %v282_v17 }
  0xa8   : > { %302 = vst.msk [vmem:[#allocation2] sm:$0xff] %vm265_vm0, %v300_v20 }
  0xad   : > { %v298_v22 = vpop.f32.mrf.mxu0 }
  0xaf   : > { %v306_v24 = vld [vmem:[#allocation2] sm:$0xff] }
  0xb0   : > { %v307_v25 = vmul.f32 0.002, %v306_v24 }
  0xb2   : > { %v312_v26 = vadd.f32 %v311_v23, %v307_v25 }
  0xb4   : > { %v462_v27 = vmax.f32 %v312_v26, -128.0 }
  0xb6   : > { %v463_v28 = vmin.f32 %v462_v27, 127.0 }
  0xb8   : > { %v472_v29 = vcvt.f32.s32 %v463_v28 }
  0xba   : > { %v319_v30 = vpack.c.b16 %v472_v29, %v472_v29 }
  0xbc   : > { %v320_v31 = vpack.c.b8 %v319_v30, %v319_v30 }
  0xbe   : > { %322 = vst.msk [vmem:[%s239_s11] sm:$0x3] %vm321_vm2, %v320_v31 }
  0xbf   : > { %572 = shalt.err (!%p569_p7)
}
  0xc0   : > { %473 = dma.vmem_to_hbm [thread:$0]  (%p713_p3), %s340_s20, 32, %s342_s21, %s324_s15  }
  0xc1 PF: > { %p479_p9 = scmp.ge.s32.totalorder %s639_s19, 2  ;;  %s353_s5 = sand.u32 1, %s611_s12  }
  0xc2   : > { %s354_s8 = scalar_lea.sflag [#allocation4], %s353_s5 }
  0xc3   : > { %p476_p10 = pnand %p479_p9, %p722_p8 }
  0xc5   : > { %p477_p11 = pneg %p476_p10 }
  0xc7   : > { %606 = dma.done.wait (%p477_p11), %s354_s8, 32  }
  0xc8   : > { %608 = vsyncadd (%p477_p11), %s354_s8, 4294967264  ;;  %s16_s19 = sadd.s32 1, %s639_s19   ;;  %s798_s12 = smov %s615_s13 }
  0xc9   : > { %p13_p12 = scmp.ge.s32.totalorder %s16_s19, 10   ;;  %s799_s13 = smov %s619_s14 }
  0xca   : > { %s800_s14 = smov %s731_s30  ;;  %s801_s15 = smov %s631_s17 }
  0xcb   : > { %s802_s16 = smov %s635_s18  ;;  %s803_s17 = smov %s806_s22 }
  0xcc   : > { %s804_s18 = smov %s810_s23  ;;  %15 = sbr.rel (!%p13_p12) target bundleno = 5 (0x5), region = 81 }
  0xd1   :  { %360 = vsyncpa [#allocation4], 1 }
  0xd2   :  { %362 = vsyncpa [#allocation4 + $0x1], 1 }

</bundles_post_ra>
